<compile_context>
chip_gen: v6e
topology: v6e:2x2x1
jax: 0.10.0
libtpu: 0.0.40
codegen_flags: <defaults>
</compile_context>

<pallas_src>
import jax
import jax.numpy as jnp
from jax.experimental import pallas as pl
from jax.experimental.pallas import tpu as pltpu

IN_DIM = 128
HID_DIM = 256
OUT_DIM = 128


def mlp_kernel(x_ref, w1_ref, b1_ref, w2_ref, b2_ref, o_ref):
    # Fused per-tile: cast -> matmul -> bias+ReLU (f32) -> matmul -> bias+ReLU -> store.
    x = x_ref[...].astype(w1_ref.dtype)                                # in-kernel cast (VPU, free)
    h = jnp.dot(x, w1_ref[...], preferred_element_type=jnp.float32)    # MXU, f32 accumulate
    h = jnp.maximum(h + b1_ref[...], 0.0)                              # bias + ReLU in f32
    h = h.astype(w2_ref.dtype)                                         # back to MXU input dtype
    y = jnp.dot(h, w2_ref[...], preferred_element_type=jnp.float32)
    y = jnp.maximum(y + b2_ref[...], 0.0)
    o_ref[...] = y.astype(o_ref.dtype)


def _round_up(n, m):
    return ((n + m - 1) // m) * m


def _num_tensorcores():
    """Best-effort TensorCore-per-chip count; defaults to 1 (safe: skips tile halving)."""
    try:
        info = pltpu.get_tpu_info()
        for attr in ("num_cores", "tensor_cores", "num_tensorcores", "cores_per_chip"):
            n = getattr(info, attr, None)
            if isinstance(n, int) and n > 0:
                return n
    except Exception:
        pass
    return 1


def prepare_params(w1, b1, w2, b2, compute_dtype=jnp.bfloat16):
    """One-time parameter prep (hoisted out of the per-call path).

    Weights -> compute_dtype (bf16 MXU inputs by default), biases -> (1, N) f32
    so they are added after the f32 accumulation.
    """
    w1c = jnp.asarray(w1, compute_dtype).reshape(IN_DIM, HID_DIM)
    w2c = jnp.asarray(w2, compute_dtype).reshape(HID_DIM, OUT_DIM)
    b1c = jnp.asarray(b1, jnp.float32).reshape(1, HID_DIM)
    b2c = jnp.asarray(b2, jnp.float32).reshape(1, OUT_DIM)
    return w1c, b1c, w2c, b2c


def body_large_forward(x, w1c, b1c, w2c, b2c, *, batch_tile=4096, out_dtype=None,
                       vmem_limit_bytes=None):
    """Fused two-layer MLP forward.  x: (B, 128) -> (B, 128).

    Params must already be prepared via prepare_params (weights in compute dtype,
    biases as (1, N) f32).  Compute dtype is taken from the weights.
    """
    B = x.shape[0]
    assert x.shape[1] == IN_DIM
    if out_dtype is None:
        out_dtype = x.dtype

    any_bf16 = (jnp.dtype(w1c.dtype) == jnp.dtype(jnp.bfloat16)
                or jnp.dtype(out_dtype) == jnp.dtype(jnp.bfloat16)
                or jnp.dtype(x.dtype) == jnp.dtype(jnp.bfloat16))
    align = 16 if any_bf16 else 8

    # Tile: as large as requested, clamped to the (aligned) batch.  No host padding:
    # the ragged last block is handled by Pallas' masked partial loads/stores.
    tile = _round_up(min(batch_tile, _round_up(B, align)), align)
    # On 2-TC parts (v7x megacore), make sure the "parallel" batch axis has >=2 steps
    # so both cores get work.  On 1-TC parts this would be pure grid-step overhead.
    if (pl.cdiv(B, tile) == 1 and _num_tensorcores() >= 2
            and B >= 2 * align and tile > align):
        tile = _round_up(pl.cdiv(tile, 2), align)
    grid = (pl.cdiv(B, tile),)

    cost = pl.CostEstimate(
        flops=2 * B * (IN_DIM * HID_DIM + HID_DIM * OUT_DIM),
        transcendentals=0,
        bytes_accessed=(B * IN_DIM * jnp.dtype(x.dtype).itemsize
                        + B * OUT_DIM * jnp.dtype(out_dtype).itemsize
                        + (IN_DIM * HID_DIM + HID_DIM * OUT_DIM) * jnp.dtype(w1c.dtype).itemsize
                        + (HID_DIM + OUT_DIM) * 4),
    )

    compiler_params = pltpu.CompilerParams(
        dimension_semantics=("parallel",),
        vmem_limit_bytes=vmem_limit_bytes,
    )

    return pl.pallas_call(
        mlp_kernel,
        out_shape=jax.ShapeDtypeStruct((B, OUT_DIM), out_dtype),
        grid_spec=pltpu.PrefetchScalarGridSpec(
            num_scalar_prefetch=0,
            grid=grid,
            in_specs=[
                pl.BlockSpec((tile, IN_DIM), lambda i: (i, 0)),      # x tile (native dtype, streamed)
                pl.BlockSpec((IN_DIM, HID_DIM), lambda i: (0, 0)),   # w1 (constant block -> resident)
                pl.BlockSpec((1, HID_DIM), lambda i: (0, 0)),        # b1 (resident)
                pl.BlockSpec((HID_DIM, OUT_DIM), lambda i: (0, 0)),  # w2 (resident)
                pl.BlockSpec((1, OUT_DIM), lambda i: (0, 0)),        # b2 (resident)
            ],
            out_specs=pl.BlockSpec((tile, OUT_DIM), lambda i: (i, 0)),
        ),
        compiler_params=compiler_params,
        cost_estimate=cost,
    )(x, w1c, b1c, w2c, b2c)


def reference_forward(x, w1, b1, w2, b2):
    h = jnp.maximum(x @ w1 + b1, 0.0)
    return jnp.maximum(h @ w2 + b2, 0.0)


if __name__ == "__main__":
    key = jax.random.PRNGKey(0)
    k_x, k_w1, k_b1, k_w2, k_b2, k_x2 = jax.random.split(key, 6)

    # Deterministic parameter init (uniform +-1/sqrt(fan_in), like PyTorch Linear default).
    bound1 = 1.0 / (IN_DIM ** 0.5)
    bound2 = 1.0 / (HID_DIM ** 0.5)
    w1 = jax.random.uniform(k_w1, (IN_DIM, HID_DIM), minval=-bound1, maxval=bound1, dtype=jnp.float32)
    b1 = jax.random.uniform(k_b1, (HID_DIM,), minval=-bound1, maxval=bound1, dtype=jnp.float32)
    w2 = jax.random.uniform(k_w2, (HID_DIM, OUT_DIM), minval=-bound2, maxval=bound2, dtype=jnp.float32)
    b2 = jax.random.uniform(k_b2, (OUT_DIM,), minval=-bound2, maxval=bound2, dtype=jnp.float32)

    # One-time parameter prep (hoisted out of the forward path).
    params_bf16 = prepare_params(w1, b1, w2, b2, compute_dtype=jnp.bfloat16)
    params_f32 = prepare_params(w1, b1, w2, b2, compute_dtype=jnp.float32)

    # Small-shape check (B=8), f32 compute path: must match the reference tightly.
    B = 8
    x = jax.random.normal(k_x, (B, IN_DIM), dtype=jnp.float32)
    ref = reference_forward(x, w1, b1, w2, b2)
    out_f32 = jax.block_until_ready(body_large_forward(x, *params_f32))
    assert out_f32.shape == (B, OUT_DIM)
    assert jnp.allclose(out_f32, ref, atol=1e-5, rtol=1e-5), "f32 path mismatch vs reference"

    # Same batch, default bf16-MXU path (x stays f32, cast in-kernel): loose tolerance.
    out_bf16 = jax.block_until_ready(body_large_forward(x, *params_bf16))
    assert out_bf16.shape == (B, OUT_DIM)
    assert jnp.allclose(out_bf16, ref, atol=5e-2, rtol=5e-2), "bf16 path mismatch vs reference"

    # bf16 output variant (lane-dense 128-wide stores stay unmasked).
    out_bf16o = jax.block_until_ready(
        body_large_forward(x, *params_bf16, out_dtype=jnp.bfloat16))
    assert out_bf16o.dtype == jnp.bfloat16
    assert jnp.allclose(out_bf16o.astype(jnp.float32), ref, atol=5e-2, rtol=5e-2), \
        "bf16-output path mismatch vs reference"

    # Ragged batch (B=200): exercises partial last block (no host pad / output slice).
    B2 = 200
    x2 = jax.random.normal(k_x2, (B2, IN_DIM), dtype=jnp.float32)
    out2 = jax.block_until_ready(body_large_forward(x2, *params_bf16))
    ref2 = reference_forward(x2, w1, b1, w2, b2)
    assert out2.shape == (B2, OUT_DIM)
    assert jnp.allclose(out2, ref2, atol=5e-2, rtol=5e-2), "ragged-batch path mismatch vs reference"

    print("KERNEL_OK")
</pallas_src>

<mosaic_0001>
module attributes {stable_mosaic.version = 11 : i64} {
  func.func @mlp_kernel(%arg0: i32, %arg1: memref<8x128xf32, #tpu.memory_space<vmem>>, %arg2: memref<128x256xf32, #tpu.memory_space<vmem>>, %arg3: memref<1x256xf32, #tpu.memory_space<vmem>>, %arg4: memref<256x128xf32, #tpu.memory_space<vmem>>, %arg5: memref<1x128xf32, #tpu.memory_space<vmem>>, %arg6: memref<8x128xf32, #tpu.memory_space<vmem>>) attributes {dimension_semantics = [#tpu.dimension_semantics<parallel>], iteration_bounds = array<i64: 1>, scalar_prefetch = 0 : i64, scratch_operands = 0 : i64, tpu.core_type = #tpu.core_type<tc>, window_params = [{transform_indices = @transform_0, window_bounds = array<i64: 8, 128>}, {pipeline_mode = #tpu.pipeline_mode<synchronous>, transform_indices = @transform_1, window_bounds = array<i64: 128, 256>}, {pipeline_mode = #tpu.pipeline_mode<synchronous>, transform_indices = @transform_2, window_bounds = array<i64: 1, 256>}, {pipeline_mode = #tpu.pipeline_mode<synchronous>, transform_indices = @transform_3, window_bounds = array<i64: 256, 128>}, {pipeline_mode = #tpu.pipeline_mode<synchronous>, transform_indices = @transform_4, window_bounds = array<i64: 1, 128>}, {transform_indices = @transform_5, window_bounds = array<i64: 8, 128>}]} {
    %c0 = arith.constant 0 : index
    %c0_0 = arith.constant 0 : index
    %0 = vector.load %arg1[%c0, %c0_0] : memref<8x128xf32, #tpu.memory_space<vmem>>, vector<8x128xf32>
    %c0_1 = arith.constant 0 : index
    %c0_2 = arith.constant 0 : index
    %1 = vector.load %arg2[%c0_1, %c0_2] : memref<128x256xf32, #tpu.memory_space<vmem>>, vector<128x256xf32>
    %cst = arith.constant dense<0.000000e+00> : vector<8x256xf32>
    %2 = tpu.matmul %0, %1, %cst {dimension_numbers = #tpu.dot_dimension_numbers<[1], [0], [0], [1], [0, 0, 1, 1], [], []>} : vector<8x128xf32>, vector<128x256xf32>, vector<8x256xf32> -> vector<8x256xf32>
    %c0_3 = arith.constant 0 : index
    %c0_4 = arith.constant 0 : index
    %3 = vector.load %arg3[%c0_3, %c0_4] : memref<1x256xf32, #tpu.memory_space<vmem>>, vector<1x256xf32>
    %4 = vector.broadcast %3 : vector<1x256xf32> to vector<8x256xf32>
    %5 = arith.addf %2, %4 : vector<8x256xf32>
    %cst_5 = arith.constant 0.000000e+00 : f32
    %6 = vector.broadcast %cst_5 : f32 to vector<8x256xf32>
    %7 = arith.maximumf %5, %6 : vector<8x256xf32>
    %c0_6 = arith.constant 0 : index
    %c0_7 = arith.constant 0 : index
    %8 = vector.load %arg4[%c0_6, %c0_7] : memref<256x128xf32, #tpu.memory_space<vmem>>, vector<256x128xf32>
    %cst_8 = arith.constant dense<0.000000e+00> : vector<8x128xf32>
    %9 = tpu.matmul %7, %8, %cst_8 {dimension_numbers = #tpu.dot_dimension_numbers<[1], [0], [0], [1], [0, 0, 1, 1], [], []>} : vector<8x256xf32>, vector<256x128xf32>, vector<8x128xf32> -> vector<8x128xf32>
    %c0_9 = arith.constant 0 : index
    %c0_10 = arith.constant 0 : index
    %10 = vector.load %arg5[%c0_9, %c0_10] : memref<1x128xf32, #tpu.memory_space<vmem>>, vector<1x128xf32>
    %11 = vector.broadcast %10 : vector<1x128xf32> to vector<8x128xf32>
    %12 = arith.addf %9, %11 : vector<8x128xf32>
    %cst_11 = arith.constant 0.000000e+00 : f32
    %13 = vector.broadcast %cst_11 : f32 to vector<8x128xf32>
    %14 = arith.maximumf %12, %13 : vector<8x128xf32>
    %c0_12 = arith.constant 0 : index
    %c0_13 = arith.constant 0 : index
    %15 = vector.load %arg6[%c0_12, %c0_13] : memref<8x128xf32, #tpu.memory_space<vmem>>, vector<8x128xf32>
    tpu.vector_store %arg6[%c0_12, %c0_13], %14 {strides = array<i32>} : memref<8x128xf32, #tpu.memory_space<vmem>>, vector<8x128xf32>,
    return
  }
  func.func @transform_0(%arg0: i32) -> (i32, i32) {
    %c0_i32 = arith.constant 0 : i32
    %c0_i32_0 = arith.constant 0 : i32
    return %arg0, %c0_i32 : i32, i32
  }
  func.func @transform_1(%arg0: i32) -> (i32, i32) {
    %c0_i32 = arith.constant 0 : i32
    %c0_i32_0 = arith.constant 0 : i32
    %c0_i32_1 = arith.constant 0 : i32
    return %c0_i32, %c0_i32_0 : i32, i32
  }
  func.func @transform_2(%arg0: i32) -> (i32, i32) {
    %c0_i32 = arith.constant 0 : i32
    %c0_i32_0 = arith.constant 0 : i32
    %c0_i32_1 = arith.constant 0 : i32
    return %c0_i32, %c0_i32_0 : i32, i32
  }
  func.func @transform_3(%arg0: i32) -> (i32, i32) {
    %c0_i32 = arith.constant 0 : i32
    %c0_i32_0 = arith.constant 0 : i32
    %c0_i32_1 = arith.constant 0 : i32
    return %c0_i32, %c0_i32_0 : i32, i32
  }
  func.func @transform_4(%arg0: i32) -> (i32, i32) {
    %c0_i32 = arith.constant 0 : i32
    %c0_i32_0 = arith.constant 0 : i32
    %c0_i32_1 = arith.constant 0 : i32
    return %c0_i32, %c0_i32_0 : i32, i32
  }
  func.func @transform_5(%arg0: i32) -> (i32, i32) {
    %c0_i32 = arith.constant 0 : i32
    %c0_i32_0 = arith.constant 0 : i32
    return %arg0, %c0_i32 : i32, i32
  }
}

</mosaic_0001>

<bundles_post_ra>
// kernel: tpu_custom_call.1
= control target key start
LH: loop header
LB: loop body
LE: loop exit
PB: predicated region body
PF: predicated region fallthrough
CT: control target
= control target key end

     0   :  { %10 = vsyncpa [#allocation3], 0  ;;  %s493_s0 = inlined_call_operand.hbm [shape: f32[8,128], index: 0, kind: input, shape index: {}]   ;;  %s494_s1 = inlined_call_operand.hbm [shape: f32[128,256], index: 1, kind: input, shape index: {}]   ;;  %s495_s2 = inlined_call_operand.vmem [shape: f32[1,256], index: 2, kind: input, shape index: {}]   ;;  %s496_s3 = inlined_call_operand.hbm [shape: f32[256,128], index: 3, kind: input, shape index: {}]   ;;  %s497_s4 = inlined_call_operand.vmem [shape: f32[1,128], index: 4, kind: input, shape index: {}]   ;;  %s498_s5 = inlined_call_operand.hbm [shape: f32[8,128], index: 5, kind: output, shape index: {}]  }
   0x1   :  { %11 = vsyncpa [#allocation6], 0 }
   0x2   :  { %12 = vsyncpa [#allocation4], 0  ;;  %s436_s18 = smov [#allocation5]  }
   0x3   :  { %s28_s19 = sshll.u32 %s436_s18, 4  ;;  %s29_s19 = int_to_ptr.vmem [resolvable:$true] %s28_s19 }
   0x4   :  { %s358_s20 = scalar_lea.vmem %s29_s19, 4096  ;;  %p363_p1 = scmp.lt.s32.totalorder %s29_s19, %s29_s19 }
   0x5   :  { %p359_p0 = scmp.ne.s32.totalorder %s29_s19, %s358_s20  ;;  %p364_p2 = scmp.lt.s32.totalorder %s358_s20, %s358_s20 }
   0x7   :  { %p365_p3 = por %p364_p2, %p363_p1 }
   0x9   :  { %p366_p4 = pnand %p365_p3, %p359_p0 }
   0xb   :  { %369 = shalt.err (!%p366_p4)
}
   0xc   :  { %s437_s21 = smov 256   ;;  %s438_s22 = smov 16  }
   0xd   :  { %34 = dma.hbm_to_vmem [thread:$0]  %s494_s1, 4096, %s29_s19, [#allocation6], %s437_s21, %s437_s21, %s438_s22  }
   0xe   :  { %s439_s25 = smov [#allocation2]   ;;  %s440_s27 = smov [#allocation7]  }
   0xf   :  { %s19_s26 = sshll.u32 %s439_s25, 4  ;;  %s42_s28 = sshll.u32 %s440_s27, 4  ;;  %s20_s26 = int_to_ptr.vmem [resolvable:$true] %s19_s26  ;;  %s43_s28 = int_to_ptr.vmem [resolvable:$true] %s42_s28 }
  0x10   :  { %s378_s29 = scalar_lea.vmem %s20_s26, 128  ;;  %p383_p6 = scmp.lt.s32.totalorder %s20_s26, %s20_s26 }
  0x11   :  { %p379_p5 = scmp.ne.s32.totalorder %s20_s26, %s378_s29  ;;  %p384_p7 = scmp.lt.s32.totalorder %s378_s29, %s378_s29 }
  0x13   :  { %p385_p8 = por %p384_p7, %p383_p6 }
  0x15   :  { %p386_p9 = pnand %p385_p8, %p379_p5 }
  0x17   :  { %389 = shalt.err (!%p386_p9)
}
  0x18   :  { %22 = dma.hbm_to_vmem [thread:$0]  %s493_s0, 128, %s20_s26, [#allocation3]  }
  0x19   :  { %s398_s7 = scalar_lea.vmem %s43_s28, 4096  ;;  %p403_p11 = scmp.lt.s32.totalorder %s43_s28, %s43_s28 }
  0x1a   :  { %p399_p10 = scmp.ne.s32.totalorder %s43_s28, %s398_s7  ;;  %p404_p12 = scmp.lt.s32.totalorder %s398_s7, %s398_s7 }
  0x1c   :  { %p405_p13 = por %p404_p12, %p403_p11 }
  0x1e   :  { %p406_p0 = pnand %p405_p13, %p399_p10 }
  0x20   :  { %409 = shalt.err (!%p406_p0)
}
  0x21   :  { %s441_s1 = smov 128   ;;  %s442_s8 = smov 8  }
  0x22   :  { %48 = dma.hbm_to_vmem [thread:$0]  %s496_s3, 4096, %s43_s28, [#allocation6], %s441_s1, %s441_s1, %s442_s8  }
  0x23   :  { %430 = dma.done.wait [#allocation3], 128  }
  0x24   :  { %431 = vsyncadd [#allocation3], 4294967168 }
  0x25   :  { %432 = dma.done.wait [#allocation6], 8192  }
  0x26   :  { %433 = vsyncadd [#allocation6], 4294959104  ;;  %v443_v0 = vmov 0.0   ;;  %v92_v1 = vld [vmem:[#allocation5 + $0xf8] sm:$0xff]  ;;  %v91_v2 = vld [vmem:[#allocation5 + $0xf0] sm:$0xff]  ;;  %s444_s13 = smov [#allocation8]  }
  0x27   :  { %169 = vmatprep.mubr.f32.mxu0 %v443_v0  ;;  %v90_v3 = vld [vmem:[#allocation5 + $0xe8] sm:$0xff]  ;;  %105 = vmatprep.subr.mxu0 %v92_v1  ;;  %v89_v4 = vld [vmem:[#allocation5 + $0xe0] sm:$0xff]  ;;  %v88_v5 = vld [vmem:[#allocation5 + $0xd8] sm:$0xff] }
  0x28   :  { %106 = vmatpush1.msra.mxu0 %v91_v2  ;;  %v87_v6 = vld [vmem:[#allocation5 + $0xd0] sm:$0xff]  ;;  %v86_v7 = vld [vmem:[#allocation5 + $0xc8] sm:$0xff]  ;;  %v85_v8 = vld [vmem:[#allocation5 + $0xc0] sm:$0xff]  ;;  %v95_v2 = vlaneseq }
  0x29   :  { %107 = vmatprep.subr.mxu0 %v90_v3  ;;  %v84_v9 = vld [vmem:[#allocation5 + $0xb8] sm:$0xff]  ;;  %v83_v10 = vld [vmem:[#allocation5 + $0xb0] sm:$0xff]  ;;  %v82_v11 = vld [vmem:[#allocation5 + $0xa8] sm:$0xff] }
  0x2a   :  { %108 = vmatpush1.msra.mxu0 %v89_v4  ;;  %v81_v12 = vld [vmem:[#allocation5 + $0xa0] sm:$0xff]  ;;  %v80_v13 = vld [vmem:[#allocation5 + $0x98] sm:$0xff]  ;;  %v79_v14 = vld [vmem:[#allocation5 + $0x90] sm:$0xff]  ;;  %v96_v3 = vshrl.u32 %v95_v2, 7 }
  0x2b   :  { %109 = vmatprep.subr.mxu0 %v88_v5  ;;  %v209_v15 = vld [vmem:[#allocation7 + $0xf8] sm:$0xff]  ;;  %v208_v17 = vld [vmem:[#allocation7 + $0xf0] sm:$0xff]  ;;  %v78_v18 = vld [vmem:[#allocation5 + $0x88] sm:$0xff] }
  0x2c   :  { %110 = vmatpush1.msra.mxu0 %v87_v6  ;;  %v193_v16 = vld [vmem:[#allocation7 + $0x78] sm:$0xff]  ;;  %306 = vmatprep.subr.mxu1 %v209_v15  ;;  %v192_v19 = vld [vmem:[#allocation7 + $0x70] sm:$0xff]  ;;  %v77_v20 = vld [vmem:[#allocation5 + $0x80] sm:$0xff]  ;;  %v97_v4 = vsub.s32 0, %v96_v3  ;;  %v101_v6 = vsub.s32 1, %v96_v3 }
  0x2d   :  { %111 = vmatprep.subr.mxu0 %v86_v7  ;;  %307 = vmatpush3.msra.mxu1 %v193_v16  ;;  %v207_v21 = vld [vmem:[#allocation7 + $0xe8] sm:$0xff]  ;;  %v76_v22 = vld [vmem:[#allocation5 + $0x78] sm:$0xff]  ;;  %v75_v24 = vld [vmem:[#allocation5 + $0x70] sm:$0xff] }
  0x2e   :  { %112 = vmatpush1.msra.mxu0 %v85_v8  ;;  %308 = vmatprep.subr.mxu1 %v208_v17  ;;  %v191_v23 = vld [vmem:[#allocation7 + $0x68] sm:$0xff]  ;;  %v206_v25 = vld [vmem:[#allocation7 + $0xe0] sm:$0xff]  ;;  %v205_v29 = vld [vmem:[#allocation7 + $0xd8] sm:$0xff] }
  0x2f   :  { %113 = vmatprep.subr.mxu0 %v84_v9  ;;  %309 = vmatpush3.msra.mxu1 %v192_v19  ;;  %v74_v26 = vld [vmem:[#allocation5 + $0x68] sm:$0xff]  ;;  %v190_v27 = vld [vmem:[#allocation7 + $0x60] sm:$0xff]  ;;  %v72_v30 = vld [vmem:[#allocation5 + $0x58] sm:$0xff] }
  0x30   :  { %114 = vmatpush1.msra.mxu0 %v83_v10  ;;  %310 = vmatprep.subr.mxu1 %v207_v21  ;;  %v73_v28 = vld [vmem:[#allocation5 + $0x60] sm:$0xff]  ;;  %v189_v31 = vld [vmem:[#allocation7 + $0x58] sm:$0xff]  ;;  %v71_v32 = vld [vmem:[#allocation5 + $0x50] sm:$0xff] }
  0x31   :  { %115 = vmatprep.subr.mxu0 %v82_v11  ;;  %311 = vmatpush3.msra.mxu1 %v191_v23  ;;  %v204_v33 = vld [vmem:[#allocation7 + $0xd0] sm:$0xff]  ;;  %v70_v34 = vld [vmem:[#allocation5 + $0x48] sm:$0xff]  ;;  %v69_v36 = vld [vmem:[#allocation5 + $0x40] sm:$0xff] }
  0x32   :  { %116 = vmatpush1.msra.mxu0 %v81_v12  ;;  %312 = vmatprep.subr.mxu1 %v206_v25  ;;  %v188_v35 = vld [vmem:[#allocation7 + $0x50] sm:$0xff]  ;;  %v203_v37 = vld [vmem:[#allocation7 + $0xc8] sm:$0xff]  ;;  %v68_v38 = vld [vmem:[#allocation5 + $0x38] sm:$0xff] }
  0x33   :  { %117 = vmatprep.subr.mxu0 %v80_v13  ;;  %313 = vmatpush3.msra.mxu1 %v190_v27  ;;  %v187_v39 = vld [vmem:[#allocation7 + $0x48] sm:$0xff]  ;;  %v67_v40 = vld [vmem:[#allocation5 + $0x30] sm:$0xff]  ;;  %v202_v41 = vld [vmem:[#allocation7 + $0xc0] sm:$0xff] }
  0x34   :  { %118 = vmatpush1.msra.mxu0 %v79_v14  ;;  %314 = vmatprep.subr.mxu1 %v205_v29  ;;  %v66_v42 = vld [vmem:[#allocation5 + $0x28] sm:$0xff]  ;;  %v186_v43 = vld [vmem:[#allocation7 + $0x40] sm:$0xff]  ;;  %v201_v45 = vld [vmem:[#allocation7 + $0xb8] sm:$0xff] }
  0x35   :  { %119 = vmatprep.subr.mxu0 %v78_v18  ;;  %315 = vmatpush3.msra.mxu1 %v189_v31  ;;  %v65_v44 = vld [vmem:[#allocation5 + $0x20] sm:$0xff]  ;;  %v64_v46 = vld [vmem:[#allocation5 + $0x18] sm:$0xff]  ;;  %v63_v48 = vld [vmem:[#allocation5 + $0x10] sm:$0xff] }
  0x36   :  { %120 = vmatpush1.msra.mxu0 %v77_v20  ;;  %316 = vmatprep.subr.mxu1 %v204_v33  ;;  %v185_v47 = vld [vmem:[#allocation7 + $0x38] sm:$0xff]  ;;  %v200_v49 = vld [vmem:[#allocation7 + $0xb0] sm:$0xff]  ;;  %v62_v50 = vld [vmem:[#allocation5 + $0x8] sm:$0xff] }
  0x37   :  { %121 = vmatprep.subr.mxu0 %v76_v22  ;;  %317 = vmatpush3.msra.mxu1 %v188_v35  ;;  %v184_v51 = vld [vmem:[#allocation7 + $0x30] sm:$0xff]  ;;  %v61_v52 = vld [vmem:[#allocation5] sm:$0xff]  ;;  %v199_v53 = vld [vmem:[#allocation7 + $0xa8] sm:$0xff] }
  0x38   :  { %122 = vmatpush1.msra.mxu0 %v75_v24  ;;  %318 = vmatprep.subr.mxu1 %v203_v37  ;;  %v60_v54 = vld [vmem:[#allocation2] sm:$0xff]  ;;  %v183_v55 = vld [vmem:[#allocation7 + $0x28] sm:$0xff]  ;;  %v198_v56 = vld [vmem:[#allocation7 + $0xa0] sm:$0xff] }
  0x39   :  { %123 = vmatprep.subr.mxu0 %v74_v26  ;;  %319 = vmatpush3.msra.mxu1 %v187_v39  ;;  %v182_v57 = vld [vmem:[#allocation7 + $0x20] sm:$0xff]  ;;  %v197_v58 = vld [vmem:[#allocation7 + $0x98] sm:$0xff]  ;;  %v196_v60 = vld [vmem:[#allocation7 + $0x90] sm:$0xff] }
  0x3a   :  { %124 = vmatpush1.msra.mxu0 %v73_v28  ;;  %320 = vmatprep.subr.mxu1 %v202_v41  ;;  %v181_v59 = vld [vmem:[#allocation7 + $0x18] sm:$0xff]  ;;  %v180_v61 = vld [vmem:[#allocation7 + $0x10] sm:$0xff]  ;;  %v195_v62 = vld [vmem:[#allocation7 + $0x88] sm:$0xff] }
  0x3b   :  { %125 = vmatprep.subr.mxu0 %v72_v30  ;;  %321 = vmatpush3.msra.mxu1 %v186_v43  ;;  %v179_v63 = vld [vmem:[#allocation7 + $0x8] sm:$0xff]  ;;  %v194_v0 = vld [vmem:[#allocation7 + $0x80] sm:$0xff]  ;;  %v93_v5 = vld [vmem:[%s495_s2] sm:$0x3]  ;;  %s295_s2 = sshll.u32 %s444_s13, 4  ;;  %s296_s2 = int_to_ptr.vmem [resolvable:$true] %s295_s2 }
  0x3c   :  { %126 = vmatpush1.msra.mxu0 %v71_v32  ;;  %322 = vmatprep.subr.mxu1 %v201_v45  ;;  %v178_v1 = vld [vmem:[#allocation7] sm:$0xff]  ;;  %v98_v7 = vrot.slane %v93_v5, %v97_v4  ;;  %v102_v8 = vrot.slane %v93_v5, %v101_v6  ;;  %v305_v16 = vld [vmem:[%s497_s4] ss:$0 sm:$0xff]  ;;  %s410_s14 = scalar_lea.vmem %s296_s2, 128  ;;  %p415_p2 = scmp.lt.s32.totalorder %s296_s2, %s296_s2 }
  0x3d   :  { %127 = vmatprep.subr.mxu0 %v70_v34  ;;  %323 = vmatpush3.msra.mxu1 %v185_v47  ;;  %p411_p1 = scmp.ne.s32.totalorder %s296_s2, %s410_s14  ;;  %p416_p3 = scmp.lt.s32.totalorder %s410_s14, %s410_s14 }
  0x3e   :  { %128 = vmatpush1.msra.mxu0 %v69_v36  ;;  %324 = vmatprep.subr.mxu1 %v200_v49 }
  0x3f   :  { %129 = vmatprep.subr.mxu0 %v68_v38  ;;  %325 = vmatpush3.msra.mxu1 %v184_v51  ;;  %p417_p4 = por %p416_p3, %p415_p2 }
  0x40   :  { %130 = vmatpush1.msra.mxu0 %v67_v40  ;;  %326 = vmatprep.subr.mxu1 %v199_v53 }
  0x41   :  { %131 = vmatprep.subr.mxu0 %v66_v42  ;;  %327 = vmatpush3.msra.mxu1 %v183_v55  ;;  %p418_p5 = pnand %p417_p4, %p411_p1 }
  0x42   :  { %132 = vmatpush1.msra.mxu0 %v65_v44  ;;  %328 = vmatprep.subr.mxu1 %v198_v56 }
  0x43   :  { %133 = vmatprep.subr.mxu0 %v64_v46  ;;  %329 = vmatpush3.msra.mxu1 %v182_v57 }
  0x44   :  { %134 = vmatpush1.msra.mxu0 %v63_v48  ;;  %330 = vmatprep.subr.mxu1 %v197_v58 }
  0x45   :  { %135 = vmatprep.subr.mxu0 %v62_v50  ;;  %331 = vmatpush3.msra.mxu1 %v181_v59 }
  0x46   :  { %136 = vmatpush1.msra.mxu0 %v61_v52  ;;  %332 = vmatprep.subr.mxu1 %v196_v60 }
  0x47   :  { %170 = vmatmul.mubr.f32.vlgmr.msra.gmra.mxu0 %v60_v54  ;;  %333 = vmatpush3.msra.mxu1 %v180_v61 }
  0x48   :  { %334 = vmatprep.subr.mxu1 %v195_v62 }
  0x49   :  { %335 = vmatpush3.msra.mxu1 %v179_v63 }
  0x4a   :  { %336 = vmatprep.subr.mxu1 %v194_v0 }
  0x4b   :  { %337 = vmatpush3.msra.mxu1 %v178_v1 }
 0x107   :  { %v171_v9 = vpop.f32.mrf.mxu0 }
 0x108   :  { %v172_v10 = vadd.f32 %v171_v9, %v98_v7 }
 0x109   :  { %v173_v11 = vpop.f32.mrf.mxu0 }
 0x10a   :  { %v174_v12 = vadd.f32 %v173_v11, %v102_v8  ;;  %v176_v14 = vmax.f32 %v172_v10, 0.0 }
 0x10c   :  { %v177_v13 = vmax.f32 %v174_v12, 0.0 }
 0x10e   :  { %281 = vmatprep.mubr.f32.mxu1 %v177_v13 }
 0x10f   :  { %282 = vmatmul.mubr.f32.vlgmr.msra.gmra.mxu1 %v176_v14 }
 0x1cf   :  { %v338_v15 = vpop.f32.mrf.mxu1 }
 0x1d1   :  { %v339_v17 = vpop.f32.mrf.mxu1 }
 0x1d2   :  { %v340_v18 = vadd.f32 %v339_v17, %v338_v15 }
 0x1d4   :  { %v284_v19 = vadd.f32 %v340_v18, %v305_v16 }
 0x1d6   :  { %v287_v20 = vmax.f32 %v284_v19, 0.0 }
 0x1d8   :  { %288 = vst [vmem:[#allocation8] sm:$0xff] %v287_v20 }
 0x1d9   :  { %421 = shalt.err (!%p418_p5)
}
 0x1da   :  { %298 = dma.vmem_to_hbm [thread:$0]  %s296_s2, 128, %s498_s5, [#allocation4]  }
 0x1db   :  { %434 = dma.done.wait [#allocation4], 128  }
 0x1dc   :  { %435 = vsyncadd [#allocation4], 4294967168 }
 0x1dd   :  { %302 = vsyncpa [#allocation3], 1 }
 0x1de   :  { %303 = vsyncpa [#allocation6], 1 }
 0x1df   :  { %304 = vsyncpa [#allocation4], 1 }

</bundles_post_ra>
